<compile_context>
chip_gen: v7x
topology: tpu7x:2x2x1
jax: 0.10.0
libtpu: 0.0.40
codegen_flags: <defaults>
</compile_context>

<pallas_src>
import math

import numpy as np
import jax
import jax.numpy as jnp
from jax.experimental import pallas as pl
from jax.experimental.pallas import tpu as pltpu

_TWO_PI = 2.0 * math.pi
_INV_TWO_PI = 1.0 / _TWO_PI


# ----------------------------------------------------------------------------
# helpers
# ----------------------------------------------------------------------------
def _round_up(x, m):
  return ((x + m - 1) // m) * m


def _largest_tile(dim, unit, max_tile):
  """Largest multiple of `unit` that divides `dim` (dim % unit == 0) and <= max_tile."""
  best = unit
  t = unit
  limit = min(dim, max_tile)
  while t <= limit:
    if dim % t == 0:
      best = t
    t += unit
  return best


def _choose_m_tiling(M, tm_max=512):
  """Pick (padded_M, tm) with small padding waste and large row tiles."""
  Mp = _round_up(M, 8)
  if Mp <= tm_max:
    return Mp, Mp
  tm = _largest_tile(Mp, 8, tm_max)
  if tm >= 128:
    return Mp, tm
  # awkward factorisation: accept bounded row padding instead of tiny tiles
  return _round_up(M, 256), 256


def _mosaic_params(dimension_semantics):
  # explicit scoped-VMEM limit: comfortably above our per-step footprint,
  # comfortably below v7x's 64 MiB physical VMEM.
  return pltpu.CompilerParams(
      dimension_semantics=dimension_semantics,
      vmem_limit_bytes=40 * 1024 * 1024)


# ----------------------------------------------------------------------------
# Pallas kernels
# ----------------------------------------------------------------------------
def _matmul_kernel_acc(a_ref, b_ref, o_ref, acc_ref):
  """Tiled matmul with f32 accumulator scratch (grid = (M, N, K) tiles)."""
  @pl.when(pl.program_id(2) == 0)
  def _():
    acc_ref[...] = jnp.zeros_like(acc_ref)

  acc_ref[...] += jnp.dot(a_ref[...], b_ref[...],
                          preferred_element_type=jnp.float32)

  @pl.when(pl.program_id(2) == pl.num_programs(2) - 1)
  def _():
    o_ref[...] = acc_ref[...].astype(o_ref.dtype)


def _matmul_kernel_single(a_ref, b_ref, o_ref):
  """Matmul when the whole contraction dim fits one tile (no scratch)."""
  o_ref[...] = jnp.dot(a_ref[...], b_ref[...],
                       preferred_element_type=jnp.float32).astype(o_ref.dtype)


def pallas_matmul(a, b, n_out=None, compute_dtype=jnp.bfloat16,
                  tm_max=512, tk_max=768, tn_max=768):
  """C = A @ B on the MXU, bf16 operands, f32 accumulation.

  `b` may be passed pre-padded to a 128-aligned (zero filled) shape; use
  `n_out` to recover the logical number of output columns.
  """
  M, Ka = a.shape
  Kb, Nb = b.shape
  if n_out is None:
    n_out = Nb

  Mp, tm = _choose_m_tiling(M, tm_max)
  Kp = _round_up(max(Ka, Kb), 128)
  Np = _round_up(Nb, 128)
  tk = _largest_tile(Kp, 128, tk_max)
  tn = _largest_tile(Np, 128, tn_max)

  a = a.astype(compute_dtype)
  if a.shape != (Mp, Kp):
    a = jnp.pad(a, ((0, Mp - M), (0, Kp - Ka)))
  b = b.astype(compute_dtype)
  if b.shape != (Kp, Np):
    b = jnp.pad(b, ((0, Kp - Kb), (0, Np - Nb)))

  nk = Kp // tk
  if nk == 1:
    out = pl.pallas_call(
        _matmul_kernel_single,
        out_shape=jax.ShapeDtypeStruct((Mp, Np), jnp.float32),
        grid_spec=pltpu.PrefetchScalarGridSpec(
            num_scalar_prefetch=0,
            grid=(Mp // tm, Np // tn),
            in_specs=[
                pl.BlockSpec((tm, Kp), lambda i, j: (i, 0)),
                pl.BlockSpec((Kp, tn), lambda i, j: (0, j)),
            ],
            out_specs=pl.BlockSpec((tm, tn), lambda i, j: (i, j)),
        ),
        compiler_params=_mosaic_params(("parallel", "parallel")),
    )(a, b)
  else:
    out = pl.pallas_call(
        _matmul_kernel_acc,
        out_shape=jax.ShapeDtypeStruct((Mp, Np), jnp.float32),
        grid_spec=pltpu.PrefetchScalarGridSpec(
            num_scalar_prefetch=0,
            grid=(Mp // tm, Np // tn, nk),
            in_specs=[
                pl.BlockSpec((tm, tk), lambda i, j, k: (i, k)),
                pl.BlockSpec((tk, tn), lambda i, j, k: (k, j)),
            ],
            out_specs=pl.BlockSpec((tm, tn), lambda i, j, k: (i, j)),
            scratch_shapes=[pltpu.VMEM((tm, tn), jnp.float32)],
        ),
        compiler_params=_mosaic_params(("parallel", "parallel", "arbitrary")),
    )(a, b)
  return out[:M, :n_out]


def _phase_vocoder_kernel(re0_ref, im0_ref, re1_ref, im1_ref,
                          ang0_ref, ang1_ref, alpha_ref, padv_ref,
                          mag_ref, dphi_ref):
  """Elementwise part of torchaudio.functional.phase_vocoder.

  Rows = (batch, stretched time step), lanes = frequency bins.  alpha is a
  per-row column (tr, 1); phase_advance is a per-lane row (1, F); both are
  broadcast inside the kernel instead of being materialized at full size.
  """
  re0 = re0_ref[...]
  im0 = im0_ref[...]
  re1 = re1_ref[...]
  im1 = im1_ref[...]
  norm0 = jnp.sqrt(re0 * re0 + im0 * im0)
  norm1 = jnp.sqrt(re1 * re1 + im1 * im1)
  alpha = alpha_ref[...]                 # (tr, 1) -> lane broadcast
  mag_ref[...] = alpha * norm1 + (1.0 - alpha) * norm0

  padv = padv_ref[...]                   # (1, F) -> sublane broadcast
  ph = ang1_ref[...] - ang0_ref[...] - padv
  # wrap to (-pi, pi]:  ph - 2*pi*round(ph / 2*pi)   (round via floor(x+0.5))
  ph = ph - _TWO_PI * jnp.floor(ph * _INV_TWO_PI + 0.5)
  dphi_ref[...] = ph + padv


def _choose_row_tile(R, n_lanes, budget_bytes=16 * 1024 * 1024):
  # 8 inputs + 2 outputs, f32, double-buffered
  per_row = 10 * n_lanes * 4 * 2
  tr_max = max(8, min(512, (budget_bytes // max(per_row, 1)) // 8 * 8))
  return _largest_tile(R, 8, tr_max)


def _phase_vocoder_elementwise(re0, im0, re1, im1, ang0, ang1,
                               alpha_col, padv_row):
  R, F_ = re0.shape
  tr = _choose_row_tile(R, F_)
  row_spec = pl.BlockSpec((tr, F_), lambda i: (i, 0))
  mag, dphi = pl.pallas_call(
      _phase_vocoder_kernel,
      out_shape=(jax.ShapeDtypeStruct((R, F_), jnp.float32),
                 jax.ShapeDtypeStruct((R, F_), jnp.float32)),
      grid_spec=pltpu.PrefetchScalarGridSpec(
          num_scalar_prefetch=0,
          grid=(R // tr,),
          in_specs=[row_spec] * 6 + [
              pl.BlockSpec((tr, 1), lambda i: (i, 0)),
              pl.BlockSpec((1, F_), lambda i: (0, 0)),
          ],
          out_specs=(row_spec, row_spec),
      ),
      compiler_params=_mosaic_params(("parallel",)),
  )(re0, im0, re1, im1, ang0, ang1, alpha_col, padv_row)
  return mag, dphi


# ----------------------------------------------------------------------------
# Deterministic parameter construction (replaces torchaudio kernel init)
# ----------------------------------------------------------------------------
def _hann_window(win_length):
  n = np.arange(win_length, dtype=np.float64)
  return 0.5 - 0.5 * np.cos(2.0 * np.pi * n / win_length)  # periodic hann


def _sinc_resample_kernel(orig_freq, new_freq, gcd,
                          lowpass_filter_width=6, rolloff=0.99):
  """torchaudio.functional._get_sinc_resample_kernel ('sinc_interp_hann')."""
  orig_freq = int(orig_freq) // gcd
  new_freq = int(new_freq) // gcd
  base_freq = min(orig_freq, new_freq) * rolloff
  width = math.ceil(lowpass_filter_width * orig_freq / base_freq)
  idx = np.arange(-width, width + orig_freq, dtype=np.float64) / orig_freq
  t = np.arange(0, -new_freq, -1, dtype=np.float64)[:, None] / new_freq + idx[None, :]
  t = t * base_freq
  t = np.clip(t, -lowpass_filter_width, lowpass_filter_width)
  window = np.cos(t * np.pi / lowpass_filter_width / 2.0) ** 2
  t = t * np.pi
  scale = base_freq / orig_freq
  safe_t = np.where(t == 0.0, 1.0, t)
  kernel = np.where(t == 0.0, 1.0, np.sin(safe_t) / safe_t)
  kernel = kernel * window * scale
  return kernel.astype(np.float32), width, orig_freq, new_freq  # (new, kw)


# ----------------------------------------------------------------------------
# PitchShiftLayer (forward pass) in JAX + Pallas
# ----------------------------------------------------------------------------
class PitchShiftLayerPallas:

  def __init__(self, pshift_range=(-2, 2), resample_source_fs=4000,
               strecth_n_fft=512, win_length=None, hop_length=None):
    self.pshift_range = list(pshift_range)
    self.fs = int(resample_source_fs)
    self.n_fft = int(strecth_n_fft)
    self.win_length = int(win_length) if win_length is not None else self.n_fft
    self.hop_length = int(hop_length) if hop_length is not None else self.win_length // 4
    self.n_freq = self.n_fft // 2 + 1
    self.two_f = 2 * self.n_freq

    # --- analysis / synthesis window (hann, padded to n_fft like torch.stft)
    w = _hann_window(self.win_length)
    if self.win_length < self.n_fft:
      w_full = np.zeros(self.n_fft, dtype=np.float64)
      lpad = (self.n_fft - self.win_length) // 2
      w_full[lpad:lpad + self.win_length] = w
    else:
      w_full = w
    self.window = w_full.astype(np.float32)

    # --- forward DFT matrix (window folded in):  frames @ W_fwd -> [Re | Im]
    n = np.arange(self.n_fft, dtype=np.float64)
    k = np.arange(self.n_freq, dtype=np.float64)
    ang = 2.0 * np.pi * np.outer(n, k) / self.n_fft               # (n_fft, F)
    w_col = w_full[:, None]
    W_fwd = np.concatenate([w_col * np.cos(ang), -w_col * np.sin(ang)], axis=1)
    self.W_fwd_p = self._pad_const(W_fwd)                         # (Kp, Np) bf16

    # --- inverse DFT matrix (irfft + synthesis window folded in)
    c = np.ones(self.n_freq, dtype=np.float64)
    c[1:-1] = 2.0                                                 # DC / Nyquist weight 1
    angT = ang.T                                                  # (F, n_fft)
    Cre = (c[:, None] * np.cos(angT) / self.n_fft) * w_full[None, :]
    Cim = (-c[:, None] * np.sin(angT) / self.n_fft) * w_full[None, :]
    self.W_inv_p = self._pad_const(np.concatenate([Cre, Cim], axis=0))

    # --- per-semitone resampling kernels (the "pshifters[str(s)].kernel" params)
    self.resample_params = {}
    for s in range(self.pshift_range[0], self.pshift_range[1] + 1):
      if s == 0:
        continue
      rate = 2.0 ** (-float(s) / 12.0)
      of, nf = int(self.fs / rate), self.fs
      g = math.gcd(of, nf)
      ker, width, orig, new = _sinc_resample_kernel(of, nf, g)    # ker: (new, kw)
      kw = ker.shape[1]
      n_chunks = 1 + int(math.ceil(2.0 * width / orig))           # kw <= n_chunks*orig
      kwp = n_chunks * orig
      kT = np.zeros((kwp, new), dtype=np.float32)
      kT[:kw, :] = ker.T
      self.resample_params[s] = dict(
          orig=orig, new=new, width=width, kw=kw, kwp=kwp, n_chunks=n_chunks,
          kernel_T_p=self._pad_const(kT))

  @staticmethod
  def _pad_const(m):
    """Pad a (K, N) constant to a 128-aligned shape and cast to bf16 once."""
    K, N = np.asarray(m).shape
    Kp, Np = _round_up(K, 128), _round_up(N, 128)
    mp = np.zeros((Kp, Np), dtype=np.float32)
    mp[:K, :N] = m
    return jnp.asarray(mp, dtype=jnp.bfloat16)

  # ---------------- framing (strided slices, no gather) ----------------
  @staticmethod
  def _frame(xp, n_frames, stride, width):
    B = xp.shape[0]
    if width % stride == 0:
      C = width // stride
      chunks = [xp[:, c * stride: c * stride + n_frames * stride]
                .reshape(B, n_frames, stride) for c in range(C)]
      return jnp.concatenate(chunks, axis=-1)
    # TODO(synk): generic stride (does not divide width) falls back to a gather;
    # a fully fused Pallas framing+matmul kernel could avoid materializing frames.
    idx = (np.arange(n_frames)[:, None] * stride + np.arange(width)[None, :])
    return xp[:, idx]

  # ---------------- STFT (center=True, reflect pad), time-major output -------
  def _stft(self, x2):
    B, _ = x2.shape
    pad = self.n_fft // 2
    xp = jnp.pad(x2, ((0, 0), (pad, pad)), mode="reflect")
    n_frames = 1 + (xp.shape[1] - self.n_fft) // self.hop_length
    frames = self._frame(xp, n_frames, self.hop_length, self.n_fft)
    spec = pallas_matmul(frames.reshape(B * n_frames, self.n_fft),
                         self.W_fwd_p, n_out=self.two_f)
    return spec.reshape(B, n_frames, self.two_f)                  # (B, NT, 2F)

  # ---------------- phase vocoder time stretch (time-major) ----------------
  def _phase_vocoder(self, spec, rate):
    B, NT, _ = spec.shape
    F_ = self.n_freq
    re = spec[..., :F_]
    im = spec[..., F_:]

    time_steps = np.arange(0.0, float(NT), rate)
    NTp = len(time_steps)
    NTp_pad = _round_up(NTp, 8)                                   # 8-aligned rows
    pad_t = NTp_pad - NTp
    t0 = np.concatenate([np.floor(time_steps), np.zeros(pad_t)]).astype(np.int32)
    alphas = np.concatenate([time_steps % 1.0,
                             np.zeros(pad_t)]).astype(np.float32)
    phase_adv = np.linspace(0.0, np.pi * self.hop_length, F_).astype(np.float32)

    rep = jnp.pad(re, ((0, 0), (0, 2), (0, 0)))
    imp = jnp.pad(im, ((0, 0), (0, 2), (0, 0)))
    re0, im0 = rep[:, t0, :], imp[:, t0, :]
    re1, im1 = rep[:, t0 + 1, :], imp[:, t0 + 1, :]

    # TODO(synk): arctan2 / cos / sin / cumsum stay in plain-JAX glue; the rest
    # of the elementwise math runs in the tiled Pallas kernel below.
    ang0 = jnp.arctan2(im0, re0)
    ang1 = jnp.arctan2(im1, re1)
    phase0 = jnp.arctan2(im[:, 0, :], re[:, 0, :])                # (B, F)

    R = B * NTp_pad
    flat = lambda a: a.reshape(R, F_).astype(jnp.float32)
    alpha_col = jnp.asarray(np.tile(alphas, B)[:, None])          # (R, 1)
    padv_row = jnp.asarray(phase_adv[None, :])                    # (1, F)

    mag, dphi = _phase_vocoder_elementwise(
        flat(re0), flat(im0), flat(re1), flat(im1),
        flat(ang0), flat(ang1), alpha_col, padv_row)

    mag = mag.reshape(B, NTp_pad, F_)[:, :NTp]
    dphi = dphi.reshape(B, NTp_pad, F_)[:, :NTp]
    dphi = jnp.concatenate([phase0[:, None, :], dphi[:, :-1, :]], axis=1)
    phase_acc = jnp.cumsum(dphi, axis=1)
    out_re = mag * jnp.cos(phase_acc)
    out_im = mag * jnp.sin(phase_acc)
    return jnp.concatenate([out_re, out_im], axis=-1)             # (B, NTp, 2F)

  # ---------------- ISTFT ----------------
  def _istft(self, spec_s, length):
    B, NT, _ = spec_s.shape
    hop, n_fft = self.hop_length, self.n_fft
    frames = pallas_matmul(spec_s.reshape(B * NT, self.two_f),
                           self.W_inv_p, n_out=n_fft)             # windowed frames
    frames = frames.reshape(B, NT, n_fft)

    out_len = (NT - 1) * hop + n_fft
    if n_fft % hop == 0:
      # overlap-add as n_fft/hop shifted dense adds (no scatter)
      C = n_fft // hop
      fr4 = frames.reshape(B, NT, C, hop)
      y = None
      for c in range(C):
        seg = fr4[:, :, c, :].reshape(B, NT * hop)
        seg = jnp.pad(seg, ((0, 0), (c * hop, out_len - (c + NT) * hop)))
        y = seg if y is None else y + seg
    else:
      # TODO(synk): non-divisible hop falls back to a scatter-add overlap-add.
      idx = (np.arange(NT)[:, None] * hop + np.arange(n_fft)[None, :]).reshape(-1)
      y = jnp.zeros((B, out_len), jnp.float32).at[:, idx].add(frames.reshape(B, -1))

    # window-square envelope depends only on NT and the window -> host precompute
    env = np.zeros(out_len, np.float64)
    wsq = self.window.astype(np.float64) ** 2
    for t in range(NT):
      env[t * hop:t * hop + n_fft] += wsq
    env_inv = (1.0 / np.clip(env, 1e-11, None)).astype(np.float32)
    y = y * jnp.asarray(env_inv)[None, :]

    start = n_fft // 2
    y = y[:, start:start + length]
    if y.shape[1] < length:
      y = jnp.pad(y, ((0, 0), (0, length - y.shape[1])))
    return y

  # ---------------- windowed-sinc resampling (conv1d as frames @ K.T) -------
  def _resample(self, y, params):
    B, L = y.shape
    orig, new, width = params["orig"], params["new"], params["width"]
    kwp = params["kwp"]
    n_frames = L // orig + 1
    needed = (n_frames - 1) * orig + kwp
    base = L + 2 * width + orig
    right = width + orig + max(0, needed - base)                  # extra zeros hit zero taps
    ypad = jnp.pad(y, ((0, 0), (width, right)))
    frames = self._frame(ypad, n_frames, orig, kwp)               # (B, n_frames, kwp)
    out = pallas_matmul(frames.reshape(B * n_frames, kwp),
                        params["kernel_T_p"], n_out=new)
    out = out.reshape(B, n_frames * new)
    target_length = int(math.ceil(new * L / orig))
    return out[:, :target_length]

  # ---------------- forward ----------------
  def __call__(self, x, semitone):
    if semitone == 0:
      return x
    if not (min(self.pshift_range) <= semitone <= max(self.pshift_range)):
      raise ValueError(f"semitone must be in range {self.pshift_range}")

    orig_shape = x.shape
    T = orig_shape[-1]
    x2 = x.reshape(-1, T).astype(jnp.float32)                     # pack batch

    rate = 2.0 ** (-float(semitone) / 12.0)
    spec = self._stft(x2)                                         # (B, NT, 2F)
    spec_s = self._phase_vocoder(spec, rate)                      # (B, NTp, 2F)
    len_stretch = int(round(T / rate))
    y = self._istft(spec_s, len_stretch)
    y = self._resample(y, self.resample_params[semitone])

    if y.shape[-1] >= T:
      y = y[:, :T]
    else:
      y = jnp.pad(y, ((0, 0), (0, T - y.shape[-1])))
    return y.reshape(orig_shape)                                  # unpack batch


# ----------------------------------------------------------------------------
if __name__ == "__main__":
  key = jax.random.PRNGKey(0)
  B, T = 2, 512
  x = jax.random.normal(key, (B, 1, T), dtype=jnp.float32)

  # Small but structurally faithful configuration of the module.
  layer = PitchShiftLayerPallas(pshift_range=[-2, 2],
                                resample_source_fs=400,
                                strecth_n_fft=64)

  y0 = layer(x, 0)        # identity path
  y_up = layer(x, 2)      # pitch up 2 semitones
  y_dn = layer(x, -2)     # pitch down 2 semitones
  jax.block_until_ready((y0, y_up, y_dn))

  assert y0.shape == x.shape
  assert y_up.shape == x.shape and y_up.dtype == jnp.float32
  assert y_dn.shape == x.shape and y_dn.dtype == jnp.float32
  assert bool(jnp.all(jnp.isfinite(y_up))) and bool(jnp.all(jnp.isfinite(y_dn)))
  print("KERNEL_OK")
</pallas_src>

<mosaic_0001>
module attributes {stable_mosaic.version = 11 : i64} {
  func.func @_matmul_kernel_single(%arg0: i32, %arg1: i32, %arg2: memref<72x128xbf16, #tpu.memory_space<vmem>>, %arg3: memref<128x128xbf16, #tpu.memory_space<vmem>>, %arg4: memref<72x128xf32, #tpu.memory_space<vmem>>) attributes {dimension_semantics = [#tpu.dimension_semantics<parallel>, #tpu.dimension_semantics<parallel>], iteration_bounds = array<i64: 1, 1>, scalar_prefetch = 0 : i64, scratch_operands = 0 : i64, tpu.core_type = #tpu.core_type<tc>, window_params = [{transform_indices = @transform_0, window_bounds = array<i64: 72, 128>}, {transform_indices = @transform_1, window_bounds = array<i64: 128, 128>}, {transform_indices = @transform_2, window_bounds = array<i64: 72, 128>}]} {
    %c0 = arith.constant 0 : index
    %c0_0 = arith.constant 0 : index
    %0 = vector.load %arg2[%c0, %c0_0] : memref<72x128xbf16, #tpu.memory_space<vmem>>, vector<72x128xbf16>
    %c0_1 = arith.constant 0 : index
    %c0_2 = arith.constant 0 : index
    %1 = vector.load %arg3[%c0_1, %c0_2] : memref<128x128xbf16, #tpu.memory_space<vmem>>, vector<128x128xbf16>
    %cst = arith.constant dense<0.000000e+00> : vector<72x128xf32>
    %2 = tpu.matmul %0, %1, %cst {dimension_numbers = #tpu.dot_dimension_numbers<[1], [0], [0], [1], [0, 0, 1, 1], [], []>} : vector<72x128xbf16>, vector<128x128xbf16>, vector<72x128xf32> -> vector<72x128xf32>
    %c0_3 = arith.constant 0 : index
    %c0_4 = arith.constant 0 : index
    %3 = vector.load %arg4[%c0_3, %c0_4] : memref<72x128xf32, #tpu.memory_space<vmem>>, vector<72x128xf32>
    tpu.vector_store %arg4[%c0_3, %c0_4], %2 {strides = array<i32>} : memref<72x128xf32, #tpu.memory_space<vmem>>, vector<72x128xf32>,
    return
  }
  func.func @transform_0(%arg0: i32, %arg1: i32) -> (i32, i32) {
    %c0_i32 = arith.constant 0 : i32
    %c0_i32_0 = arith.constant 0 : i32
    return %arg0, %c0_i32 : i32, i32
  }
  func.func @transform_1(%arg0: i32, %arg1: i32) -> (i32, i32) {
    %c0_i32 = arith.constant 0 : i32
    %c0_i32_0 = arith.constant 0 : i32
    return %c0_i32, %arg1 : i32, i32
  }
  func.func @transform_2(%arg0: i32, %arg1: i32) -> (i32, i32) {
    %c0_i32 = arith.constant 0 : i32
    return %arg0, %arg1 : i32, i32
  }
}

</mosaic_0001>

<bundles_post_ra>
// kernel: tpu_custom_call.1
= control target key start
LH: loop header
LB: loop body
LE: loop exit
PB: predicated region body
PF: predicated region fallthrough
CT: control target
= control target key end

     0   :  { %7 = vsyncpa [#allocation3], 0  ;;  %s478_s0 = inlined_call_operand.hbm [shape: bf16[72,128], index: 0, kind: input, shape index: {}]   ;;  %s479_s1 = inlined_call_operand.hbm [shape: bf16[128,128], index: 1, kind: input, shape index: {}]   ;;  %s480_s2 = inlined_call_operand.hbm [shape: f32[72,128], index: 2, kind: output, shape index: {}]  }
   0x1   :  { %8 = vsyncpa [#allocation6], 0 }
   0x2   :  { %9 = vsyncpa [#allocation4], 0  ;;  %s413_s9 = smov [#allocation2]   ;;  %s341_s13 = scalar_lea.hbm %s478_s0, 576 }
   0x3   :  { %s15_s10 = sshll.u32 %s413_s9, 4  ;;  %p342_p0 = scmp.ne.s32.totalorder %s478_s0, %s341_s13  ;;  %s16_s10 = int_to_ptr.vmem [resolvable:$true] %s15_s10 }
   0x4   :  { %p345_p1 = scmp.lt.u32.totalorder %s341_s13, %s478_s0 }
   0x6   :  { %p347_p2 = pnand %p345_p1, %p342_p0 }
   0x8   :  { %350 = shalt.err (!%p347_p2)
}
   0x9   :  { %s351_s18 = scalar_lea.vmem %s16_s10, 576  ;;  %p356_p4 = scmp.lt.s32.totalorder %s16_s10, %s16_s10 }
   0xa   :  { %p352_p3 = scmp.ne.s32.totalorder %s16_s10, %s351_s18  ;;  %p357_p5 = scmp.lt.s32.totalorder %s351_s18, %s351_s18 }
   0xc   :  { %p358_p6 = por %p357_p5, %p356_p4 }
   0xe   :  { %p359_p7 = pnand %p358_p6, %p352_p3 }
  0x10   :  { %362 = shalt.err (!%p359_p7)
}
  0x11   :  { %s414_s19 = smov 64   ;;  %s415_s20 = smov 4  }
  0x12   :  { %21 = dma.hbm_to_vmem [thread:$0]  %s478_s0, 576, %s16_s10, [#allocation3], %s414_s19, %s414_s19, %s415_s20  }
  0x13   :  { %s416_s23 = smov [#allocation5]   ;;  %s363_s27 = scalar_lea.hbm %s479_s1, 1024 }
  0x14   :  { %s27_s24 = sshll.u32 %s416_s23, 4  ;;  %p364_p8 = scmp.ne.s32.totalorder %s479_s1, %s363_s27  ;;  %s28_s24 = int_to_ptr.vmem [resolvable:$true] %s27_s24 }
  0x15   :  { %p367_p9 = scmp.lt.u32.totalorder %s363_s27, %s479_s1 }
  0x17   :  { %p369_p10 = pnand %p367_p9, %p364_p8 }
  0x19   :  { %372 = shalt.err (!%p369_p10)
}
  0x1a   :  { %s373_s4 = scalar_lea.vmem %s28_s24, 1024  ;;  %p378_p12 = scmp.lt.s32.totalorder %s28_s24, %s28_s24 }
  0x1b   :  { %p374_p11 = scmp.ne.s32.totalorder %s28_s24, %s373_s4  ;;  %p379_p13 = scmp.lt.s32.totalorder %s373_s4, %s373_s4 }
  0x1d   :  { %p380_p0 = por %p379_p13, %p378_p12 }
  0x1f   :  { %p381_p1 = pnand %p380_p0, %p374_p11 }
  0x21   :  { %384 = shalt.err (!%p381_p1)
}
  0x22   :  { %33 = dma.hbm_to_vmem [thread:$0]  %s479_s1, 1024, %s28_s24, [#allocation6], %s414_s19, %s414_s19, %s415_s20  }
  0x23   :  { %407 = dma.done.wait [#allocation3], 576  }
  0x24   :  { %408 = vsyncadd [#allocation3], 4294966720 }
  0x25   :  { %409 = dma.done.wait [#allocation6], 1024  }
  0x26   :  { %410 = vsyncadd [#allocation6], 4294966272  ;;  %v417_v0 = vmov 0.0   ;;  %vm418_vm0 = vmmov 0   ;;  %v328_v1 = vld [vmem:[#allocation5] sm:$0xff]   ;;  %v329_v2 = vld [vmem:[#allocation5 + $0x8] sm:$0xff]  }
  0x27   :  { %267 = vmatprep.subr.bf16.mxu0 %v417_v0  ;;  %303 = vmatprep.subr.bf16.mxu1 %v417_v0  ;;  %v330_v3 = vld [vmem:[#allocation5 + $0x10] sm:$0xff]   ;;  %v331_v4 = vld [vmem:[#allocation5 + $0x18] sm:$0xff]   ;;  %v332_v5 = vld [vmem:[#allocation5 + $0x20] sm:$0xff]   ;;  %s419_s1 = smov [#allocation7]  }
  0x28   :  { %283 = vmatprep.mubr.msk.bf16.mxu0 %vm418_vm0, %v417_v0  ;;  %295 = vmatprep.mubr.msk.bf16.mxu1 %vm418_vm0, %v417_v0  ;;  %v333_v6 = vld [vmem:[#allocation5 + $0x28] sm:$0xff]   ;;  %v334_v7 = vld [vmem:[#allocation5 + $0x30] sm:$0xff]   ;;  %v335_v8 = vld [vmem:[#allocation5 + $0x38] sm:$0xff]   ;;  %s228_s6 = sshll.u32 %s419_s1, 4  ;;  %s229_s6 = int_to_ptr.vmem [resolvable:$true] %s228_s6 }
  0x29   :  { %268 = vmatpush3.bf16.msra.mxu0 %v328_v1  ;;  %311 = vmatpush3.bf16.msra.mxu1 %v328_v1  ;;  %v336_v9 = vld [vmem:[#allocation2] sm:$0xff]   ;;  %v337_v10 = vld [vmem:[#allocation2 + $0x18] sm:$0xff]   ;;  %v338_v11 = vld [vmem:[#allocation2 + $0x8] sm:$0xff]   ;;  %s385_s7 = scalar_lea.vmem %s229_s6, 1152  ;;  %p390_p3 = scmp.lt.s32.totalorder %s229_s6, %s229_s6 }
  0x2a   :  { %269 = vmatprep.subr.bf16.mxu0 %v417_v0  ;;  %304 = vmatprep.subr.bf16.mxu1 %v417_v0  ;;  %v339_v12 = vld [vmem:[#allocation2 + $0x20] ss:$0 sps:$4 sm:$0xff]   ;;  %v340_v13 = vld [vmem:[#allocation2 + $0x10] sm:$0xff]   ;;  %p386_p2 = scmp.ne.s32.totalorder %s229_s6, %s385_s7  ;;  %p391_p4 = scmp.lt.s32.totalorder %s385_s7, %s385_s7 }
  0x2c   :  { %p392_p5 = por %p391_p4, %p390_p3 }
  0x2d   :  { %270 = vmatpush3.bf16.msra.mxu0 %v329_v2  ;;  %312 = vmatpush3.bf16.msra.mxu1 %v329_v2 }
  0x2e   :  { %271 = vmatprep.subr.bf16.mxu0 %v417_v0  ;;  %305 = vmatprep.subr.bf16.mxu1 %v417_v0  ;;  %p393_p6 = pnand %p392_p5, %p386_p2 }
  0x31   :  { %272 = vmatpush3.bf16.msra.mxu0 %v330_v3  ;;  %313 = vmatpush3.bf16.msra.mxu1 %v330_v3 }
  0x32   :  { %273 = vmatprep.subr.bf16.mxu0 %v417_v0  ;;  %306 = vmatprep.subr.bf16.mxu1 %v417_v0 }
  0x35   :  { %274 = vmatpush3.bf16.msra.mxu0 %v331_v4  ;;  %314 = vmatpush3.bf16.msra.mxu1 %v331_v4 }
  0x36   :  { %275 = vmatprep.subr.bf16.mxu0 %v417_v0  ;;  %307 = vmatprep.subr.bf16.mxu1 %v417_v0 }
  0x39   :  { %276 = vmatpush3.bf16.msra.mxu0 %v332_v5  ;;  %315 = vmatpush3.bf16.msra.mxu1 %v332_v5 }
  0x3a   :  { %277 = vmatprep.subr.bf16.mxu0 %v417_v0  ;;  %308 = vmatprep.subr.bf16.mxu1 %v417_v0 }
  0x3d   :  { %278 = vmatpush3.bf16.msra.mxu0 %v333_v6  ;;  %316 = vmatpush3.bf16.msra.mxu1 %v333_v6 }
  0x3e   :  { %279 = vmatprep.subr.bf16.mxu0 %v417_v0  ;;  %309 = vmatprep.subr.bf16.mxu1 %v417_v0 }
  0x41   :  { %280 = vmatpush3.bf16.msra.mxu0 %v334_v7  ;;  %317 = vmatpush3.bf16.msra.mxu1 %v334_v7 }
  0x42   :  { %281 = vmatprep.subr.bf16.mxu0 %v417_v0  ;;  %310 = vmatprep.subr.bf16.mxu1 %v417_v0 }
  0x45   :  { %282 = vmatpush3.bf16.msra.mxu0 %v335_v8  ;;  %318 = vmatpush3.bf16.msra.mxu1 %v335_v8 }
  0x48   :  { %284 = vmatmul.mubr.bf16.vlgmr.msra.gmra.mrb[0].mxu0 %v336_v9  ;;  %296 = vmatmul.mubr.bf16.vlgmr.msra.gmra.mrb[0].mxu1 %v337_v10 }
  0x49   :  { %287 = vmatprep.mubr.msk.bf16.mxu0 %vm418_vm0, %v417_v0  ;;  %299 = vmatprep.mubr.msk.bf16.mxu1 %vm418_vm0, %v417_v0 }
  0x50   :  { %288 = vmatmul.mubr.bf16.gmra.mrb[4].mxu0 %v338_v11  ;;  %300 = vmatmul.mubr.bf16.gmra.mrb[4].mxu1 %v339_v12 }
  0x51   :  { %291 = vmatprep.mubr.msk.bf16.mxu0 %vm418_vm0, %v417_v0 }
  0x58   :  { %292 = vmatmul.mubr.bf16.gmra.mrb[8].mxu0 %v340_v13 }
 0x11b   :  { %v176_v14 = vpop.f32.mrb[0].mxu0  ;;  %v200_v15 = vpop.f32.mrb[0].mxu1 }
 0x11c   :  { %214 = vst [vmem:[#allocation7] sm:$0xff] %v176_v14  ;;  %v285_v16 = vpop.f32.mrb[1].mxu0  ;;  %220 = vst [vmem:[#allocation7 + $0x30] sm:$0xff] %v200_v15  ;;  %v297_v17 = vpop.f32.mrb[1].mxu1 }
 0x11d   :  { %v179_v18 = vpop.f32.mrb[2].mxu0  ;;  %v203_v19 = vpop.f32.mrb[2].mxu1 }
 0x11e   :  { %215 = vst [vmem:[#allocation7 + $0x8] sm:$0xff] %v179_v18  ;;  %v286_v20 = vpop.f32.mrb[3].mxu0  ;;  %221 = vst [vmem:[#allocation7 + $0x38] sm:$0xff] %v203_v19  ;;  %v298_v21 = vpop.f32.mrb[3].mxu1 }
 0x123   :  { %v184_v22 = vpop.f32.mrb[4].mxu0  ;;  %v208_v23 = vpop.f32.mrb[4].mxu1 }
 0x124   :  { %216 = vst [vmem:[#allocation7 + $0x10] sm:$0xff] %v184_v22  ;;  %v289_v24 = vpop.f32.mrb[5].mxu0  ;;  %222 = vst [vmem:[#allocation7 + $0x40] sm:$0xff] %v208_v23  ;;  %v301_v25 = vpop.f32.mrb[5].mxu1 }
 0x125   :  { %v187_v26 = vpop.f32.mrb[6].mxu0  ;;  %v211_v27 = vpop.f32.mrb[6].mxu1 }
 0x126   :  { %217 = vst [vmem:[#allocation7 + $0x18] sm:$0xff] %v187_v26  ;;  %v290_v28 = vpop.f32.mrb[7].mxu0  ;;  %v302_v29 = vpop.f32.mrb[7].mxu1 }
 0x12b   :  { %v192_v30 = vpop.f32.mrb[8].mxu0 }
 0x12c   :  { %218 = vst [vmem:[#allocation7 + $0x20] sm:$0xff] %v192_v30  ;;  %v293_v31 = vpop.f32.mrb[9].mxu0 }
 0x12d   :  { %v195_v32 = vpop.f32.mrb[10].mxu0 }
 0x12e   :  { %219 = vst [vmem:[#allocation7 + $0x28] sm:$0xff] %v195_v32  ;;  %v294_v33 = vpop.f32.mrb[11].mxu0 }
 0x12f   :  { %396 = shalt.err (!%p393_p6)
}
 0x130   :  { %s397_s10 = scalar_lea.hbm %s480_s2, 1152 }
 0x131   :  { %p398_p7 = scmp.ne.s32.totalorder %s480_s2, %s397_s10  ;;  %p401_p8 = scmp.lt.u32.totalorder %s397_s10, %s480_s2 }
 0x133   :  { %p403_p9 = pnand %p401_p8, %p398_p7 }
 0x135   :  { %406 = shalt.err (!%p403_p9)
}
 0x136   :  { %s420_s15 = smov 128   ;;  %s421_s16 = smov 8  }
 0x137   :  { %234 = dma.vmem_to_hbm [thread:$0]  %s229_s6, 1152, %s480_s2, [#allocation4], %s420_s15, %s420_s15, %s421_s16  }
 0x138   :  { %411 = dma.done.wait [#allocation4], 1152  }
 0x139   :  { %412 = vsyncadd [#allocation4], 4294966144 }
 0x13a   :  { %238 = vsyncpa [#allocation3], 1 }
 0x13b   :  { %239 = vsyncpa [#allocation6], 1 }
 0x13c   :  { %240 = vsyncpa [#allocation4], 1 }

</bundles_post_ra>
